<compile_context>
chip_gen: v6e
topology: v6e:2x2x1
jax: 0.10.0
libtpu: 0.0.40
codegen_flags: <defaults>
</compile_context>

<pallas_src>
import functools
import math

import jax
import jax.numpy as jnp
from jax.experimental import pallas as pl
from jax.experimental.pallas import tpu as pltpu


# --------------------------------------------------------------------------------------
# Kernel
# --------------------------------------------------------------------------------------
def _ffn_kernel(x_ref, g_ref, b_ref, w1_ref, b1_ref, w2_ref, b2_ref, o_ref,
                xn_ref, acc_ref, *, mm_dtype, gelu_dtype):
    j = pl.program_id(1)  # dff-chunk index (reduction axis, innermost)

    # ---- j == 0: LayerNorm once per row tile; zero the f32 accumulator ----
    @pl.when(j == 0)
    def _():
        x = x_ref[...].astype(jnp.float32)
        mean = jnp.mean(x, axis=-1, keepdims=True)
        var = jnp.mean((x - mean) * (x - mean), axis=-1, keepdims=True)
        # gamma folded into the rsqrt scale (eps = 1e-6, matches nn.LayerNorm(..., eps=1e-06)).
        scale = jax.lax.rsqrt(var + 1e-6) * g_ref[...]
        xn = (x - mean) * scale + b_ref[...]
        xn_ref[...] = xn.astype(mm_dtype)            # cached for every dff chunk of this row tile
        acc_ref[...] = jnp.zeros_like(acc_ref)

    # ---- every j: Linear1 chunk -> (dropout=identity) -> GELU -> acc += chunk @ W2 slice ----
    h = jnp.dot(xn_ref[...], w1_ref[...], preferred_element_type=jnp.float32)
    h = h + b1_ref[...]
    # Dropout: module evaluated in inference mode -> identity.
    # TODO(synk): training-mode dropout (random mask) not implemented.
    h = h.astype(gelu_dtype)
    # Exact erf-based GELU (matches PyTorch nn.GELU() default) in gelu_dtype.
    h = 0.5 * h * (1.0 + jax.lax.erf(h * jnp.asarray(0.7071067811865476, gelu_dtype)))
    acc_ref[...] += jnp.dot(h.astype(mm_dtype), w2_ref[...],
                            preferred_element_type=jnp.float32)

    # ---- last j: add output bias and store the lane-dense tile ----
    @pl.when(j == pl.num_programs(1) - 1)
    def _():
        o_ref[...] = (acc_ref[...] + b2_ref[...]).astype(o_ref.dtype)


# --------------------------------------------------------------------------------------
# Tile / VMEM heuristics
# --------------------------------------------------------------------------------------
def _round_up(v, m):
    return ((v + m - 1) // m) * m


def _vmem_budget_bytes():
    """Generation-aware usable-VMEM cap (physical capacity minus headroom for Mosaic)."""
    cap = 64 * 1024 * 1024  # conservative fallback (v7x-sized)
    try:
        info = pltpu.get_tpu_info()
        cap = int(getattr(info, "vmem_capacity_bytes", cap))
    except Exception:
        pass
    # ~52 MiB on a 64 MiB chip (v7x), ~105 MiB on a 128 MiB chip (v5e/v6e).
    return max(32 * 1024 * 1024, int(cap * 0.82))


def _vmem_need(tm, tdff, D, x_it, out_it, mm_it, wbuf):
    need = 2 * tm * D * x_it                       # x row tile (double-buffered)
    need += 2 * tm * D * out_it                    # output tile (double-buffered)
    need += 2 * 3 * D * 4                          # gamma, beta, b2 (f32, tiny)
    need += wbuf * (D * tdff + tdff * D) * mm_it   # W1 / W2 chunks
    need += wbuf * tdff * 4                        # b1 chunk (f32)
    need += tm * D * mm_it                         # cached LayerNorm(x) scratch
    need += tm * D * 4                             # f32 accumulator scratch
    return need


def _tm_candidates(n_pad, align):
    cands = []
    for c in (1024, 768, 512, 384, 256, 128, 64, 32, 16, 8):
        if c % align:
            continue
        t = min(c, n_pad)
        if t not in cands:
            cands.append(t)
    # Prefer >= 2 row tiles (v7x has 2 TensorCores sharing the parallel axis) when there is
    # enough work that the largest candidate would otherwise cover all rows in one tile.
    if n_pad >= 512 and cands and cands[0] >= n_pad:
        half = max(align, _round_up(pl.cdiv(n_pad, 2), align))
        if half < n_pad and half not in cands:
            cands.insert(0, half)
        elif half in cands:
            cands.remove(half)
            cands.insert(0, half)
    return cands


def _select_tiles(N, D, dff, x_it, out_it, mm_it, budget, align, wbuf_chunked):
    """Returns (tm, tdff, weights_resident)."""
    n_pad = _round_up(max(N, align), align)
    cands = _tm_candidates(n_pad, align)

    # Pass 1: fully VMEM-resident weights (tdff == dff, constant weight block index
    # across the whole grid -> W1/W2 streamed from HBM exactly once).
    for tm in cands:
        if _vmem_need(tm, dff, D, x_it, out_it, mm_it, 2) <= budget:
            return tm, dff, True

    # Pass 2: chunked dff (weights re-streamed per row tile; serpentine ordering saves
    # one chunk DMA at each row-tile boundary).
    for tm in cands:
        for tdff in (1024, 512, 256, 128):
            if tdff <= dff and dff % tdff == 0 and \
               _vmem_need(tm, tdff, D, x_it, out_it, mm_it, wbuf_chunked) <= budget:
                return tm, tdff, False

    # Fallback: smallest row tile; smallest standard chunk dividing dff, else full dff.
    tm = cands[-1]
    tdff = dff
    for c in (128, 256, 512, 1024):
        if c <= dff and dff % c == 0:
            tdff = c
            break
    return tm, tdff, tdff == dff


# --------------------------------------------------------------------------------------
# Wrapper
# --------------------------------------------------------------------------------------
def feed_forward(x, gamma, beta, w1, b1, w2, b2, *,
                 matmul_dtype=None, gelu_dtype=jnp.float32, weight_buffers=2):
    """x: (B, S, D). Weights stored transposed for the y = x @ w + b convention.

    matmul_dtype defaults to the weight dtype: pass bf16 weights to run the MXU natively
    in bf16 with f32 accumulation.  gelu_dtype=jnp.bfloat16 halves VALU cost of the erf
    polynomial on v6e/v7x (bf16 VALU); keep f32 on v5e / for exact numerics.
    """
    B, S, D = x.shape
    dff = w1.shape[1]
    N = B * S
    xf = x.reshape(N, D)

    if matmul_dtype is None:
        matmul_dtype = w1.dtype
    matmul_dtype = jnp.dtype(matmul_dtype)
    x_it = jnp.dtype(x.dtype).itemsize
    out_it = x_it
    mm_it = matmul_dtype.itemsize

    # Cast weights to the matmul dtype ONCE in the wrapper (not per grid step); keep
    # biases / LN params in f32 since they feed f32 accumulators.
    w1c = w1.astype(matmul_dtype)
    w2c = w2.astype(matmul_dtype)
    b1f = b1.astype(jnp.float32).reshape(1, dff)
    b2f = b2.astype(jnp.float32).reshape(1, D)
    gammaf = gamma.astype(jnp.float32).reshape(1, D)
    betaf = beta.astype(jnp.float32).reshape(1, D)

    # bf16 packs 16 rows per sublane tile -> keep tm a multiple of 16 there.
    align = 16 if mm_it == 2 else 8
    weight_buffers = max(2, int(weight_buffers))
    budget = _vmem_budget_bytes()
    tm, tdff, resident = _select_tiles(N, D, dff, x_it, out_it, mm_it,
                                       budget, align, weight_buffers)

    nj = dff // tdff
    grid = (pl.cdiv(N, tm), nj)

    # --- weight index maps ---------------------------------------------------------
    if resident or nj == 1:
        # Constant block index -> Pallas never re-DMAs the weights across the grid.
        w1_map = lambda i, j: (0, 0)
        b1_map = lambda i, j: (0, 0)
        w2_map = lambda i, j: (0, 0)
        weight_pipe = None
    else:
        # Serpentine dff walk: chunk at each row-tile boundary is reused (one DMA saved/tile).
        def _serp(i, j):
            return jnp.where(i % 2 == 0, j, nj - 1 - j)
        w1_map = lambda i, j: (0, _serp(i, j))
        b1_map = lambda i, j: (0, _serp(i, j))
        w2_map = lambda i, j: (_serp(i, j), 0)
        weight_pipe = pl.Buffered(weight_buffers) if weight_buffers > 2 else None

    w_kwargs = {} if weight_pipe is None else {"pipeline_mode": weight_pipe}

    # --- advisory cost estimate (consistent with the actual weight DMA pattern) -----
    flops = 4 * N * D * dff                      # two matmuls
    transcendentals = N * dff                    # erf in GELU
    w_bytes = (w1c.size + w2c.size) * mm_it + (b1f.size + b2f.size + 2 * D) * 4
    weight_passes = 1 if (resident or nj == 1) else grid[0]
    cost = pl.CostEstimate(
        flops=flops, transcendentals=transcendentals,
        bytes_accessed=int(N * D * x_it + N * D * out_it + weight_passes * w_bytes))

    need = _vmem_need(tm, tdff, D, x_it, out_it, mm_it,
                      2 if (resident or nj == 1) else weight_buffers)
    vmem_limit = int(min(budget, max(need + need // 3, 32 * 1024 * 1024)))

    kernel = functools.partial(_ffn_kernel, mm_dtype=matmul_dtype,
                               gelu_dtype=jnp.dtype(gelu_dtype))

    out = pl.pallas_call(
        kernel,
        out_shape=jax.ShapeDtypeStruct((N, D), x.dtype),
        grid_spec=pltpu.PrefetchScalarGridSpec(
            num_scalar_prefetch=0,
            grid=grid,
            in_specs=[
                pl.BlockSpec((tm, D), lambda i, j: (i, 0)),           # x rows
                pl.BlockSpec((1, D), lambda i, j: (0, 0)),            # ln gamma
                pl.BlockSpec((1, D), lambda i, j: (0, 0)),            # ln beta
                pl.BlockSpec((D, tdff), w1_map, **w_kwargs),          # W1^T chunk
                pl.BlockSpec((1, tdff), b1_map),                      # b1 chunk
                pl.BlockSpec((tdff, D), w2_map, **w_kwargs),          # W2^T chunk
                pl.BlockSpec((1, D), lambda i, j: (0, 0)),            # b2
            ],
            out_specs=pl.BlockSpec((tm, D), lambda i, j: (i, 0)),     # lane-dense output tile
            scratch_shapes=[
                pltpu.VMEM((tm, D), matmul_dtype),   # cached LayerNorm(x) tile
                pltpu.VMEM((tm, D), jnp.float32),    # f32 output accumulator
            ],
        ),
        compiler_params=pltpu.CompilerParams(
            dimension_semantics=("parallel", "arbitrary"),
            vmem_limit_bytes=vmem_limit,
        ),
        cost_estimate=cost,
    )(xf, gammaf, betaf, w1c, b1f, w2c, b2f)

    return out.reshape(B, S, D)


# --------------------------------------------------------------------------------------
# Reference + test
# --------------------------------------------------------------------------------------
def _init_params(key, d_model):
    """Deterministic init mirroring the PyTorch module's parameter shapes."""
    dff = d_model * 2
    k1, k2, k3, k4 = jax.random.split(key, 4)
    gamma = jnp.ones((d_model,), jnp.float32)          # nn.LayerNorm weight
    beta = jnp.zeros((d_model,), jnp.float32)          # nn.LayerNorm bias
    lim1 = 1.0 / math.sqrt(d_model)                    # nn.Linear(d_model, dff)
    w1 = jax.random.uniform(k1, (d_model, dff), jnp.float32, -lim1, lim1)
    b1 = jax.random.uniform(k2, (dff,), jnp.float32, -lim1, lim1)
    lim2 = 1.0 / math.sqrt(dff)                        # nn.Linear(dff, d_model)
    w2 = jax.random.uniform(k3, (dff, d_model), jnp.float32, -lim2, lim2)
    b2 = jax.random.uniform(k4, (d_model,), jnp.float32, -lim2, lim2)
    return gamma, beta, w1, b1, w2, b2


def _reference(x, gamma, beta, w1, b1, w2, b2):
    mean = jnp.mean(x, axis=-1, keepdims=True)
    var = jnp.mean((x - mean) ** 2, axis=-1, keepdims=True)
    xn = (x - mean) / jnp.sqrt(var + 1e-6) * gamma + beta
    h = xn @ w1 + b1
    h = 0.5 * h * (1.0 + jax.lax.erf(h / jnp.sqrt(2.0)))
    return h @ w2 + b2


if __name__ == "__main__":
    B, S, D = 2, 8, 32   # batch=2, seq=8, d_model=32 -> dff=64
    key = jax.random.PRNGKey(0)
    kx, kp = jax.random.split(key)
    x = jax.random.normal(kx, (B, S, D), jnp.float32)
    gamma, beta, w1, b1, w2, b2 = _init_params(kp, D)
    y_ref = _reference(x, gamma, beta, w1, b1, w2, b2)

    # f32 weights -> f32 matmul path; tight check vs pure-JAX reference.
    y = jax.block_until_ready(feed_forward(x, gamma, beta, w1, b1, w2, b2))
    assert y.shape == (B, S, D)
    assert jnp.allclose(y, y_ref, atol=1e-4, rtol=1e-4), "f32 mismatch vs reference"

    # bf16 input/weights -> native bf16 MXU operands with f32 accumulation.
    xb = x.astype(jnp.bfloat16)
    w1b, b1b, w2b, b2b = (a.astype(jnp.bfloat16) for a in (w1, b1, w2, b2))
    yb = jax.block_until_ready(feed_forward(xb, gamma, beta, w1b, b1b, w2b, b2b))
    assert jnp.allclose(yb.astype(jnp.float32), y_ref, atol=1e-1, rtol=1e-1), \
        "bf16 mismatch vs reference"

    print("KERNEL_OK")
</pallas_src>

<mosaic_0001>
module attributes {stable_mosaic.version = 11 : i64} {
  func.func @_ffn_kernel(%arg0: i32, %arg1: i32, %arg2: memref<16x32xf32, #tpu.memory_space<vmem>>, %arg3: memref<1x32xf32, #tpu.memory_space<vmem>>, %arg4: memref<1x32xf32, #tpu.memory_space<vmem>>, %arg5: memref<32x64xf32, #tpu.memory_space<vmem>>, %arg6: memref<1x64xf32, #tpu.memory_space<vmem>>, %arg7: memref<64x32xf32, #tpu.memory_space<vmem>>, %arg8: memref<1x32xf32, #tpu.memory_space<vmem>>, %arg9: memref<16x32xf32, #tpu.memory_space<vmem>>, %arg10: memref<16x32xf32, #tpu.memory_space<vmem>>, %arg11: memref<16x32xf32, #tpu.memory_space<vmem>>) attributes {dimension_semantics = [#tpu.dimension_semantics<parallel>, #tpu.dimension_semantics<arbitrary>], iteration_bounds = array<i64: 1, 1>, scalar_prefetch = 0 : i64, scratch_operands = 2 : i64, tpu.core_type = #tpu.core_type<tc>, window_params = [{transform_indices = @transform_0, window_bounds = array<i64: 16, 32>}, {pipeline_mode = #tpu.pipeline_mode<synchronous>, transform_indices = @transform_1, window_bounds = array<i64: 1, 32>}, {pipeline_mode = #tpu.pipeline_mode<synchronous>, transform_indices = @transform_2, window_bounds = array<i64: 1, 32>}, {pipeline_mode = #tpu.pipeline_mode<synchronous>, transform_indices = @transform_3, window_bounds = array<i64: 32, 64>}, {pipeline_mode = #tpu.pipeline_mode<synchronous>, transform_indices = @transform_4, window_bounds = array<i64: 1, 64>}, {pipeline_mode = #tpu.pipeline_mode<synchronous>, transform_indices = @transform_5, window_bounds = array<i64: 64, 32>}, {pipeline_mode = #tpu.pipeline_mode<synchronous>, transform_indices = @transform_6, window_bounds = array<i64: 1, 32>}, {transform_indices = @transform_7, window_bounds = array<i64: 16, 32>}]} {
    %c0_i32 = arith.constant 0 : i32
    %0 = arith.cmpi eq, %arg1, %c0_i32 : i32
    %1 = arith.extui %0 : i1 to i32
    %c0_i32_0 = arith.constant 0 : i32
    %2 = arith.cmpi ne, %1, %c0_i32_0 : i32
    scf.if %2 {
      %c0_18 = arith.constant 0 : index
      %c0_19 = arith.constant 0 : index
      %25 = vector.load %arg2[%c0_18, %c0_19] : memref<16x32xf32, #tpu.memory_space<vmem>>, vector<16x32xf32>
      %cst_20 = arith.constant dense<0.000000e+00> : vector<16xf32>
      %26 = vector.multi_reduction <add>, %25, %cst_20 [1] : vector<16x32xf32> to vector<16xf32>
      %27 = vector.shape_cast %26 : vector<16xf32> to vector<16x1xf32>
      %cst_21 = arith.constant 3.200000e+01 : f32
      %28 = vector.broadcast %cst_21 : f32 to vector<16x1xf32>
      %29 = arith.divf %27, %28 : vector<16x1xf32>
      %30 = vector.broadcast %29 : vector<16x1xf32> to vector<16x32xf32>
      %31 = arith.subf %25, %30 : vector<16x32xf32>
      %32 = vector.broadcast %29 : vector<16x1xf32> to vector<16x32xf32>
      %33 = arith.subf %25, %32 : vector<16x32xf32>
      %34 = arith.mulf %31, %33 : vector<16x32xf32>
      %cst_22 = arith.constant dense<0.000000e+00> : vector<16xf32>
      %35 = vector.multi_reduction <add>, %34, %cst_22 [1] : vector<16x32xf32> to vector<16xf32>
      %36 = vector.shape_cast %35 : vector<16xf32> to vector<16x1xf32>
      %cst_23 = arith.constant 3.200000e+01 : f32
      %37 = vector.broadcast %cst_23 : f32 to vector<16x1xf32>
      %38 = arith.divf %36, %37 : vector<16x1xf32>
      %cst_24 = arith.constant 9.99999997E-7 : f32
      %39 = vector.broadcast %cst_24 : f32 to vector<16x1xf32>
      %40 = arith.addf %38, %39 : vector<16x1xf32>
      %41 = math.rsqrt %40 : vector<16x1xf32>
      %c0_25 = arith.constant 0 : index
      %c0_26 = arith.constant 0 : index
      %42 = vector.load %arg3[%c0_25, %c0_26] : memref<1x32xf32, #tpu.memory_space<vmem>>, vector<1x32xf32>
      %43 = vector.broadcast %41 : vector<16x1xf32> to vector<16x32xf32>
      %44 = vector.broadcast %42 : vector<1x32xf32> to vector<16x32xf32>
      %45 = arith.mulf %43, %44 : vector<16x32xf32>
      %46 = vector.broadcast %29 : vector<16x1xf32> to vector<16x32xf32>
      %47 = arith.subf %25, %46 : vector<16x32xf32>
      %48 = arith.mulf %47, %45 : vector<16x32xf32>
      %c0_27 = arith.constant 0 : index
      %c0_28 = arith.constant 0 : index
      %49 = vector.load %arg4[%c0_27, %c0_28] : memref<1x32xf32, #tpu.memory_space<vmem>>, vector<1x32xf32>
      %50 = vector.broadcast %49 : vector<1x32xf32> to vector<16x32xf32>
      %51 = arith.addf %48, %50 : vector<16x32xf32>
      %c0_29 = arith.constant 0 : index
      %c0_30 = arith.constant 0 : index
      %52 = vector.load %arg10[%c0_29, %c0_30] : memref<16x32xf32, #tpu.memory_space<vmem>>, vector<16x32xf32>
      tpu.vector_store %arg10[%c0_29, %c0_30], %51 {strides = array<i32>} : memref<16x32xf32, #tpu.memory_space<vmem>>, vector<16x32xf32>,
      %cst_31 = arith.constant 0.000000e+00 : f32
      %53 = vector.broadcast %cst_31 : f32 to vector<16x32xf32>
      %c0_32 = arith.constant 0 : index
      %c0_33 = arith.constant 0 : index
      %54 = vector.load %arg11[%c0_32, %c0_33] : memref<16x32xf32, #tpu.memory_space<vmem>>, vector<16x32xf32>
      tpu.vector_store %arg11[%c0_32, %c0_33], %53 {strides = array<i32>} : memref<16x32xf32, #tpu.memory_space<vmem>>, vector<16x32xf32>,
    } else {
    }
    %c0 = arith.constant 0 : index
    %c0_1 = arith.constant 0 : index
    %3 = vector.load %arg10[%c0, %c0_1] : memref<16x32xf32, #tpu.memory_space<vmem>>, vector<16x32xf32>
    %c0_2 = arith.constant 0 : index
    %c0_3 = arith.constant 0 : index
    %4 = vector.load %arg5[%c0_2, %c0_3] : memref<32x64xf32, #tpu.memory_space<vmem>>, vector<32x64xf32>
    %cst = arith.constant dense<0.000000e+00> : vector<16x64xf32>
    %5 = tpu.matmul %3, %4, %cst {dimension_numbers = #tpu.dot_dimension_numbers<[1], [0], [0], [1], [0, 0, 1, 1], [], []>} : vector<16x32xf32>, vector<32x64xf32>, vector<16x64xf32> -> vector<16x64xf32>
    %c0_4 = arith.constant 0 : index
    %c0_5 = arith.constant 0 : index
    %6 = vector.load %arg6[%c0_4, %c0_5] : memref<1x64xf32, #tpu.memory_space<vmem>>, vector<1x64xf32>
    %7 = vector.broadcast %6 : vector<1x64xf32> to vector<16x64xf32>
    %8 = arith.addf %5, %7 : vector<16x64xf32>
    %cst_6 = arith.constant 5.000000e-01 : f32
    %9 = vector.broadcast %cst_6 : f32 to vector<16x64xf32>
    %10 = arith.mulf %9, %8 : vector<16x64xf32>
    %cst_7 = arith.constant 0.707106769 : f32
    %11 = vector.broadcast %cst_7 : f32 to vector<16x64xf32>
    %12 = arith.mulf %8, %11 : vector<16x64xf32>
    %13 = math.erf %12 : vector<16x64xf32>
    %cst_8 = arith.constant 1.000000e+00 : f32
    %14 = vector.broadcast %cst_8 : f32 to vector<16x64xf32>
    %15 = arith.addf %14, %13 : vector<16x64xf32>
    %16 = arith.mulf %10, %15 : vector<16x64xf32>
    %c0_9 = arith.constant 0 : index
    %c0_10 = arith.constant 0 : index
    %17 = vector.load %arg11[%c0_9, %c0_10] : memref<16x32xf32, #tpu.memory_space<vmem>>, vector<16x32xf32>
    %c0_11 = arith.constant 0 : index
    %c0_12 = arith.constant 0 : index
    %18 = vector.load %arg7[%c0_11, %c0_12] : memref<64x32xf32, #tpu.memory_space<vmem>>, vector<64x32xf32>
    %cst_13 = arith.constant dense<0.000000e+00> : vector<16x32xf32>
    %19 = tpu.matmul %16, %18, %cst_13 {dimension_numbers = #tpu.dot_dimension_numbers<[1], [0], [0], [1], [0, 0, 1, 1], [], []>} : vector<16x64xf32>, vector<64x32xf32>, vector<16x32xf32> -> vector<16x32xf32>
    %20 = arith.addf %17, %19 : vector<16x32xf32>
    %c0_14 = arith.constant 0 : index
    %c0_15 = arith.constant 0 : index
    %21 = vector.load %arg11[%c0_14, %c0_15] : memref<16x32xf32, #tpu.memory_space<vmem>>, vector<16x32xf32>
    tpu.vector_store %arg11[%c0_14, %c0_15], %20 {strides = array<i32>} : memref<16x32xf32, #tpu.memory_space<vmem>>, vector<16x32xf32>,
    %c0_i32_16 = arith.constant 0 : i32
    %22 = arith.cmpi eq, %arg1, %c0_i32_16 : i32
    %23 = arith.extui %22 : i1 to i32
    %c0_i32_17 = arith.constant 0 : i32
    %24 = arith.cmpi ne, %23, %c0_i32_17 : i32
    scf.if %24 {
      %c0_18 = arith.constant 0 : index
      %c0_19 = arith.constant 0 : index
      %25 = vector.load %arg11[%c0_18, %c0_19] : memref<16x32xf32, #tpu.memory_space<vmem>>, vector<16x32xf32>
      %c0_20 = arith.constant 0 : index
      %c0_21 = arith.constant 0 : index
      %26 = vector.load %arg8[%c0_20, %c0_21] : memref<1x32xf32, #tpu.memory_space<vmem>>, vector<1x32xf32>
      %27 = vector.broadcast %26 : vector<1x32xf32> to vector<16x32xf32>
      %28 = arith.addf %25, %27 : vector<16x32xf32>
      %c0_22 = arith.constant 0 : index
      %c0_23 = arith.constant 0 : index
      %29 = vector.load %arg9[%c0_22, %c0_23] : memref<16x32xf32, #tpu.memory_space<vmem>>, vector<16x32xf32>
      tpu.vector_store %arg9[%c0_22, %c0_23], %28 {strides = array<i32>} : memref<16x32xf32, #tpu.memory_space<vmem>>, vector<16x32xf32>,
    } else {
    }
    return
  }
  func.func @transform_0(%arg0: i32, %arg1: i32) -> (i32, i32) {
    %c0_i32 = arith.constant 0 : i32
    %c0_i32_0 = arith.constant 0 : i32
    return %arg0, %c0_i32 : i32, i32
  }
  func.func @transform_1(%arg0: i32, %arg1: i32) -> (i32, i32) {
    %c0_i32 = arith.constant 0 : i32
    %c0_i32_0 = arith.constant 0 : i32
    %c0_i32_1 = arith.constant 0 : i32
    return %c0_i32, %c0_i32_0 : i32, i32
  }
  func.func @transform_2(%arg0: i32, %arg1: i32) -> (i32, i32) {
    %c0_i32 = arith.constant 0 : i32
    %c0_i32_0 = arith.constant 0 : i32
    %c0_i32_1 = arith.constant 0 : i32
    return %c0_i32, %c0_i32_0 : i32, i32
  }
  func.func @transform_3(%arg0: i32, %arg1: i32) -> (i32, i32) {
    %c0_i32 = arith.constant 0 : i32
    %c0_i32_0 = arith.constant 0 : i32
    %c0_i32_1 = arith.constant 0 : i32
    return %c0_i32, %c0_i32_0 : i32, i32
  }
  func.func @transform_4(%arg0: i32, %arg1: i32) -> (i32, i32) {
    %c0_i32 = arith.constant 0 : i32
    %c0_i32_0 = arith.constant 0 : i32
    %c0_i32_1 = arith.constant 0 : i32
    return %c0_i32, %c0_i32_0 : i32, i32
  }
  func.func @transform_5(%arg0: i32, %arg1: i32) -> (i32, i32) {
    %c0_i32 = arith.constant 0 : i32
    %c0_i32_0 = arith.constant 0 : i32
    %c0_i32_1 = arith.constant 0 : i32
    return %c0_i32, %c0_i32_0 : i32, i32
  }
  func.func @transform_6(%arg0: i32, %arg1: i32) -> (i32, i32) {
    %c0_i32 = arith.constant 0 : i32
    %c0_i32_0 = arith.constant 0 : i32
    %c0_i32_1 = arith.constant 0 : i32
    return %c0_i32, %c0_i32_0 : i32, i32
  }
  func.func @transform_7(%arg0: i32, %arg1: i32) -> (i32, i32) {
    %c0_i32 = arith.constant 0 : i32
    %c0_i32_0 = arith.constant 0 : i32
    return %arg0, %c0_i32 : i32, i32
  }
}

</mosaic_0001>

<bundles_post_ra>
// kernel: tpu_custom_call.1
= control target key start
LH: loop header
LB: loop body
LE: loop exit
PB: predicated region body
PF: predicated region fallthrough
CT: control target
= control target key end

     0   :  { %vm33_vm0 = vcmask 261120   ;;  %s519_s0 = inlined_call_operand.vmem [shape: f32[16,32], index: 0, kind: input, shape index: {}]   ;;  %s520_s1 = inlined_call_operand.vmem [shape: f32[1,32], index: 1, kind: input, shape index: {}]   ;;  %s521_s2 = inlined_call_operand.vmem [shape: f32[1,32], index: 2, kind: input, shape index: {}]   ;;  %s522_s3 = inlined_call_operand.vmem [shape: f32[32,64], index: 3, kind: input, shape index: {}]   ;;  %s523_s4 = inlined_call_operand.vmem [shape: f32[1,64], index: 4, kind: input, shape index: {}]   ;;  %s524_s5 = inlined_call_operand.vmem [shape: f32[64,32], index: 5, kind: input, shape index: {}]   ;;  %s525_s6 = inlined_call_operand.vmem [shape: f32[1,32], index: 6, kind: input, shape index: {}]   ;;  %s526_s7 = inlined_call_operand.hbm [shape: f32[16,32], index: 7, kind: output, shape index: {}]  }
   0x1   :  { %v31_v0 = vld [vmem:[%s519_s0] sm:$0xff]  ;;  %v32_v1 = vld [vmem:[%s519_s0 + $0x8] sm:$0xff] }
   0x2   :  { %12 = vsyncpa [#allocation5], 0  ;;  %v34_v2 = vsel %vm33_vm0, %v31_v0, 0.0  ;;  %v37_v3 = vsel %vm33_vm0, %v32_v1, 0.0  ;;  %v88_v14 = vld [vmem:[%s522_s3 + $0x18] sm:$0xff]  ;;  %v87_v15 = vld [vmem:[%s522_s3 + $0x10] sm:$0xff] }
   0x3   :  { %35 = vadd.xlane.f32.xlu0 %v34_v2  ;;  %340 = vmatprep.subr.mxu0 %v88_v14  ;;  %v86_v16 = vld [vmem:[%s522_s3 + $0x8] sm:$0xff]  ;;  %v85_v17 = vld [vmem:[%s522_s3] sm:$0xff]  ;;  %v197_v36 = vld [vmem:[%s524_s5 + $0x38] sm:$0xff]  ;;  %v404_v44 = vmov 0.0   ;;  %vm198_vm1 = vcmask 523264   ;;  %s405_s30 = smov [#allocation4]  }
   0x4   :  { %341 = vmatpush3.msra.mxu0 %v88_v14  ;;  %v316_v24 = vld [vmem:[%s520_s1] ss:$0 sm:$0xff]  ;;  %351 = vmatprep.subr.mxu1 %v197_v36  ;;  %v196_v37 = vld [vmem:[%s524_s5 + $0x30] sm:$0xff]  ;;  %v195_v38 = vld [vmem:[%s524_s5 + $0x28] sm:$0xff]  ;;  %82 = vst.msk [vmem:[#allocation3 + $0x8] sm:$0xff] %vm33_vm0, %v404_v44  ;;  %s305_s8 = sshll.u32 %s405_s30, 4  ;;  %s306_s8 = int_to_ptr.vmem [resolvable:$true] %s305_s8 }
   0x5   :  { %342 = vmatprep.subr.mxu0 %v87_v15  ;;  %v317_v27 = vld [vmem:[%s521_s2] ss:$0 sm:$0xff]  ;;  %352 = vmatpush3.msra.mxu1 %v197_v36  ;;  %v193_v40 = vld [vmem:[%s524_s5 + $0x18] sm:$0xff]  ;;  %v192_v41 = vld [vmem:[%s524_s5 + $0x10] sm:$0xff]  ;;  %81 = vst.msk [vmem:[#allocation3] sm:$0xff] %vm33_vm0, %v404_v44  ;;  %s382_s9 = scalar_lea.vmem %s306_s8, 256  ;;  %p387_p1 = scmp.lt.s32.totalorder %s306_s8, %s306_s8 }
   0x6   :  { %343 = vmatpush3.msra.mxu0 %v87_v15  ;;  %353 = vmatprep.subr.mxu1 %v196_v37  ;;  %v194_v39 = vld [vmem:[%s524_s5 + $0x20] sm:$0xff]  ;;  %v191_v42 = vld [vmem:[%s524_s5 + $0x8] sm:$0xff]  ;;  %p383_p0 = scmp.ne.s32.totalorder %s306_s8, %s382_s9  ;;  %p388_p2 = scmp.lt.s32.totalorder %s382_s9, %s382_s9 }
   0x7   :  { %38 = vadd.xlane.f32.xlu0 %v37_v3  ;;  %344 = vmatprep.subr.mxu0 %v86_v16  ;;  %v190_v43 = vld [vmem:[%s524_s5] sm:$0xff] }
   0x8   :  { %345 = vmatpush3.msra.mxu0 %v86_v16  ;;  %354 = vmatpush3.msra.mxu1 %v196_v37  ;;  %v318_v45 = vld [vmem:[%s523_s4] ss:$0 sm:$0xff]  ;;  %p389_p3 = por %p388_p2, %p387_p1 }
   0x9   :  { %346 = vmatprep.subr.mxu0 %v85_v17  ;;  %355 = vmatprep.subr.mxu1 %v195_v38  ;;  %v323_v2 = vld [vmem:[%s525_s6] ss:$0 sm:$0xff] }
   0xa   :  { %347 = vmatpush3.msra.mxu0 %v85_v17  ;;  %356 = vmatpush3.msra.mxu1 %v195_v38  ;;  %p390_p4 = pnand %p389_p3, %p383_p0 }
   0xb   :  { %357 = vmatprep.subr.mxu1 %v194_v39  ;;  %v189_v60 = vld [vmem:[#allocation3 + $0x8] sm:$0xff] }
   0xc   :  { %358 = vmatpush3.msra.mxu1 %v194_v39  ;;  %v188_v62 = vld [vmem:[#allocation3] sm:$0xff] }
   0xd   :  { %359 = vmatprep.subr.mxu1 %v193_v40 }
   0xe   :  { %360 = vmatpush3.msra.mxu1 %v193_v40 }
   0xf   :  { %361 = vmatprep.subr.mxu1 %v192_v41 }
  0x10   :  { %362 = vmatpush3.msra.mxu1 %v192_v41 }
  0x11   :  { %363 = vmatprep.subr.mxu1 %v191_v42 }
  0x12   :  { %364 = vmatpush3.msra.mxu1 %v191_v42 }
  0x13   :  { %365 = vmatprep.subr.mxu1 %v190_v43 }
  0x14   :  { %366 = vmatpush3.msra.mxu1 %v190_v43 }
  0x8c   :  { %v36_v4 = vpop.xlane.xlu0 %35 }
  0x8d   :  { %v41_v5 = vmul.f32 0.03125, %v36_v4 }
  0x8f   :  { %v43_v6 = vsub.f32 %v31_v0, %v41_v5 }
  0x90   :  { %v39_v7 = vpop.xlane.xlu0 %38 }
  0x91   :  { %v42_v8 = vmul.f32 0.03125, %v39_v7  ;;  %v45_v9 = vmul.f32 %v43_v6, %v43_v6 }
  0x93   :  { %v44_v10 = vsub.f32 %v32_v1, %v42_v8  ;;  %v47_v11 = vsel %vm33_vm0, %v45_v9, 0.0 }
  0x94   :  { %48 = vadd.xlane.f32.xlu1 %v47_v11 }
  0x95   :  { %v46_v12 = vmul.f32 %v44_v10, %v44_v10 }
  0x97   :  { %v50_v13 = vsel %vm33_vm0, %v46_v12, 0.0 }
  0x98   :  { %51 = vadd.xlane.f32.xlu1 %v50_v13 }
 0x11d   :  { %v49_v18 = vpop.xlane.xlu1 %48 }
 0x11e   :  { %v53_v19 = vmul.f32 0.03125, %v49_v18 }
 0x120   :  { %v55_v20 = vadd.f32 1e-06, %v53_v19 }
 0x121   :  { %v52_v21 = vpop.xlane.xlu1 %51 }
 0x122   :  { %374 = vrsqrt.f32 %v55_v20  ;;  %v54_v22 = vmul.f32 0.03125, %v52_v21 }
 0x124   :  { %v56_v23 = vadd.f32 1e-06, %v54_v22 }
 0x126   :  { %376 = vrsqrt.f32 %v56_v23 }
 0x12f   :  { %v375_v25 = vpop.eup %374 }
 0x130   :  { %v66_v26 = vmul.f32 %v375_v25, %v316_v24 }
 0x132   :  { %v68_v28 = vmul.f32 %v66_v26, %v43_v6 }
 0x133   :  { %v377_v29 = vpop.eup %376 }
 0x134   :  { %v77_v30 = vadd.f32 %v317_v27, %v68_v28  ;;  %v67_v31 = vmul.f32 %v377_v29, %v316_v24 }
 0x136   :  { %79 = vst.msk [vmem:[#allocation2] sm:$0xff] %vm33_vm0, %v77_v30  ;;  %v69_v32 = vmul.f32 %v67_v31, %v44_v10 }
 0x138   :  { %v78_v33 = vadd.f32 %v317_v27, %v69_v32 }
 0x13a   :  { %80 = vst.msk [vmem:[#allocation2 + $0x8] sm:$0xff] %vm33_vm0, %v78_v33 }
 0x13d   :  { %v83_v34 = vld [vmem:[#allocation2] sm:$0xff] }
 0x13e   :  { %348 = vmatprep.mubr.msk.f32.mxu0 %vm33_vm0, %v83_v34 }
 0x141   :  { %v84_v35 = vld [vmem:[#allocation2 + $0x8] sm:$0xff] }
 0x142   :  { %349 = vmatmul.mubr.msk.f32.vlgmr.msra.gmra.mxu0 %vm33_vm0, %v84_v35 }
 0x202   :  { %v350_v46 = vpop.f32.mrf.mxu0 }
 0x203   :  { %v175_v47 = vadd.f32 %v350_v46, %v318_v45 }
 0x204   :  { %v169_v48 = vpop.f32.mrf.mxu0 }
 0x205   :  { %v181_v49 = vmul.f32 0.70710677, %v175_v47  ;;  %v170_v50 = vadd.f32 %v318_v45, %v169_v48  ;;  %v179_v57 = vmul.f32 0.5, %v175_v47 }
 0x207   :  { %378 = verf.f32 %v181_v49  ;;  %v180_v51 = vmul.f32 0.70710677, %v170_v50  ;;  %v178_v55 = vmul.f32 0.5, %v170_v50 }
 0x209   :  { %380 = verf.f32 %v180_v51 }
 0x214   :  { %v379_v52 = vpop.eup %378 }
 0x215   :  { %v185_v54 = vadd.f32 1.0, %v379_v52 }
 0x216   :  { %v381_v53 = vpop.eup %380 }
 0x217   :  { %v184_v56 = vadd.f32 1.0, %v381_v53  ;;  %v187_v59 = vmul.f32 %v185_v54, %v179_v57 }
 0x219   :  { %v186_v58 = vmul.f32 %v184_v56, %v178_v55 }
 0x21b   :  { %367 = vmatprep.mubr.msk.f32.mxu1 %vm198_vm1, %v186_v58 }
 0x21c   :  { %368 = vmatmul.mubr.msk.f32.vlgmr.msra.gmra.mxu1 %vm198_vm1, %v187_v59 }
 0x2dc   :  { %v369_v61 = vpop.f32.mrf.mxu1 }
 0x2dd   :  { %v281_v63 = vadd.f32 %v369_v61, %v189_v60 }
 0x2de   :  { %v271_v0 = vpop.f32.mrf.mxu1 }
 0x2df   :  { %283 = vst.msk [vmem:[#allocation3 + $0x8] sm:$0xff] %vm33_vm0, %v281_v63  ;;  %v280_v1 = vadd.f32 %v271_v0, %v188_v62 }
 0x2e1   :  { %282 = vst.msk [vmem:[#allocation3] sm:$0xff] %vm33_vm0, %v280_v1 }
 0x2e6   :  { %v288_v3 = vld [vmem:[#allocation3 + $0x8] sm:$0xff] }
 0x2e7   :  { %v297_v4 = vadd.f32 %v323_v2, %v288_v3 }
 0x2e8   :  { %v287_v5 = vld [vmem:[#allocation3] sm:$0xff] }
 0x2e9   :  { %v296_v6 = vadd.f32 %v323_v2, %v287_v5  ;;  %299 = vst.msk [vmem:[#allocation4 + $0x8] sm:$0xff] %vm33_vm0, %v297_v4 }
 0x2eb   :  { %298 = vst.msk [vmem:[#allocation4] sm:$0xff] %vm33_vm0, %v296_v6 }
 0x2ec   :  { %393 = shalt.err (!%p390_p4)
}
 0x2ed   :  { %s406_s10 = smov 128   ;;  %s407_s6 = smov 8  }
 0x2ee   :  { %311 = dma.vmem_to_hbm [thread:$0]  %s306_s8, 256, %s526_s7, [#allocation5], %s406_s10, %s406_s10, %s407_s6  }
 0x2ef   :  { %402 = dma.done.wait [#allocation5], 256  }
 0x2f0   :  { %403 = vsyncadd [#allocation5], 4294967040 }
 0x2f1   :  { %315 = vsyncpa [#allocation5], 1 }

</bundles_post_ra>
